<compile_context>
chip_gen: v7x
topology: tpu7x:2x2x1
jax: 0.10.0
libtpu: 0.0.40
codegen_flags: <defaults>
</compile_context>

<pallas_src>
import jax
import jax.numpy as jnp
from jax import lax
from jax.experimental import pallas as pl
from jax.experimental.pallas import tpu as pltpu


# Contract the feature (last) axis of both operands: (H, F) x (TILE_B, F) -> (H, TILE_B).
_CONTRACT_FEATURE = (((1,), (1,)), ((), ()))


def qfunc_kernel(obs_ref, act_ref,
                 w1o_ref, w1a_ref, b1_ref,
                 w2_ref, b2_ref,
                 w3_ref, b3_ref,
                 out_ref):
    """One batch tile: q^T = W3 @ relu(W2 @ relu(W1 @ [obs;act]^T + b1) + b2) + b3.

    obs/act arrive batch-major (TILE_B, feat); contracting the feature axis puts the
    batch on the lane axis for every intermediate, so the hidden activations pack
    vregs fully and the (1, TILE_B) output store is lane-dense (unmasked vst).
    """
    # Layer 1 -- split matmul over the two input streams (no concat anywhere).
    # Runs in the streaming dtype (f32 or bf16) with f32 MXU accumulation.
    h1 = lax.dot_general(w1o_ref[...], obs_ref[...], _CONTRACT_FEATURE,
                         preferred_element_type=jnp.float32)
    h1 = h1 + lax.dot_general(w1a_ref[...], act_ref[...], _CONTRACT_FEATURE,
                              preferred_element_type=jnp.float32)
    h1 = jnp.maximum(h1 + b1_ref[...], 0.0)                    # (H1, TILE_B), f32

    # Layer 2 (f32 weights, VMEM-resident via constant index map).
    h2 = jnp.dot(w2_ref[...], h1, preferred_element_type=jnp.float32) + b2_ref[...]
    h2 = jnp.maximum(h2, 0.0)                                  # (H2, TILE_B), f32

    # Output layer (identity activation); lane-dense (1, TILE_B) result.
    q = jnp.dot(w3_ref[...], h2, preferred_element_type=jnp.float32)
    out_ref[...] = q + b3_ref[0, 0]                            # scalar bias from SMEM


def _round_up(x, m):
    return (x + m - 1) // m * m


def init_params(key, obs_dim, act_dim, hidden_sizes):
    """PyTorch-style init: W (out_features, in_features), b (out_features,),
    both uniform(+-1/sqrt(fan_in)) -- matches nn.Linear defaults."""
    sizes = [obs_dim + act_dim] + list(hidden_sizes) + [1]
    params = []
    for j in range(len(sizes) - 1):
        fan_in, fan_out = sizes[j], sizes[j + 1]
        key, kw, kb = jax.random.split(key, 3)
        bound = 1.0 / (fan_in ** 0.5)
        w = jax.random.uniform(kw, (fan_out, fan_in), jnp.float32, -bound, bound)
        b = jax.random.uniform(kb, (fan_out,), jnp.float32, -bound, bound)
        params.append((w, b))
    return params


def mlp_q_function(obs, act, params, *, max_tile_b=2048):
    """Pallas forward pass.  obs: (B, obs_dim), act: (B, act_dim) -> q: (B,) float32.

    obs/act may be float32 or bfloat16; layer-1 matmuls run in that dtype (with f32
    accumulation), the rest of the network runs in f32.
    """
    B, obs_dim = obs.shape
    _, act_dim = act.shape
    (w1, b1), (w2, b2), (w3, b3) = params
    h1_dim, h2_dim = w1.shape[0], w2.shape[0]
    stream_dtype = obs.dtype

    # Kernel-layout parameters (tiny, one-off; layer-1 weights follow the streaming dtype).
    w1o = w1[:, :obs_dim].astype(stream_dtype)          # (H1, obs_dim)
    w1a = w1[:, obs_dim:].astype(stream_dtype)          # (H1, act_dim)
    b1c = b1.reshape(h1_dim, 1).astype(jnp.float32)
    w2f = w2.astype(jnp.float32)
    b2c = b2.reshape(h2_dim, 1).astype(jnp.float32)
    w3r = w3.reshape(1, h2_dim).astype(jnp.float32)
    b3s = b3.reshape(1, 1).astype(jnp.float32)          # lone scalar -> SMEM

    # Batch tile: as big as reasonable (per-step overhead dominates at small tiles),
    # kept a multiple of 128 so all block dims stay lane/sublane aligned.  Ragged B
    # is handled by Pallas OOB clipping -- no padding pass over HBM.  max_tile_b=2048
    # keeps >= 2 grid steps on large batches so "parallel" can shard across v7x's TCs.
    max_tile_b = max(128, _round_up(max_tile_b, 128))
    tile_b = min(_round_up(B, 128), max_tile_b)
    grid_b = pl.cdiv(B, tile_b)

    const = lambda i: (0, 0)          # weights/biases: resident, fetched once
    batch_in = lambda i: (i, 0)       # batch-major activations streamed over axis 0
    batch_out = lambda i: (0, i)      # feature-major (lane-dense) q row

    q2d = pl.pallas_call(
        qfunc_kernel,
        out_shape=jax.ShapeDtypeStruct((1, B), jnp.float32),
        grid=(grid_b,),
        in_specs=[
            pl.BlockSpec((tile_b, obs_dim), batch_in),
            pl.BlockSpec((tile_b, act_dim), batch_in),
            pl.BlockSpec((h1_dim, obs_dim), const),
            pl.BlockSpec((h1_dim, act_dim), const),
            pl.BlockSpec((h1_dim, 1), const),
            pl.BlockSpec((h2_dim, h1_dim), const),
            pl.BlockSpec((h2_dim, 1), const),
            pl.BlockSpec((1, h2_dim), const),
            pl.BlockSpec(memory_space=pltpu.MemorySpace.SMEM),
        ],
        out_specs=pl.BlockSpec((1, tile_b), batch_out),
        compiler_params=pltpu.CompilerParams(
            dimension_semantics=("parallel",),   # megacore sharding on v7x when grid_b > 1
        ),
    )(obs, act, w1o, w1a, b1c, w2f, b2c, w3r, b3s)

    return q2d[0]                     # torch.squeeze(q, -1) -> (B,)


def reference_q(obs, act, params):
    """Pure-JAX reference (PyTorch semantics: x @ W.T + b), full-precision f32."""
    x = jnp.concatenate([obs, act], axis=-1).astype(jnp.float32)
    (w1, b1), (w2, b2), (w3, b3) = params
    hi = lambda a, b: jnp.dot(a, b, precision=lax.Precision.HIGHEST)
    h1 = jnp.maximum(hi(x, w1.T) + b1, 0.0)
    h2 = jnp.maximum(hi(h1, w2.T) + b2, 0.0)
    q = hi(h2, w3.T) + b3
    return jnp.squeeze(q, -1)


if __name__ == "__main__":
    obs_dim, act_dim = 16, 8
    hidden_sizes = (32, 32)
    batch = 200            # deliberately NOT a multiple of 128: exercises OOB clipping

    key = jax.random.PRNGKey(0)
    k_obs, k_act, k_par = jax.random.split(key, 3)
    obs = jax.random.normal(k_obs, (batch, obs_dim), jnp.float32)
    act = jax.random.normal(k_act, (batch, act_dim), jnp.float32)
    params = init_params(k_par, obs_dim, act_dim, hidden_sizes)

    # --- f32 path: single grid step (tile_b = round_up(200, 128) = 256) ------------
    q32 = jax.block_until_ready(mlp_q_function(obs, act, params))
    ref32 = reference_q(obs, act, params)
    assert q32.shape == (batch,), q32.shape
    assert jnp.allclose(q32, ref32, atol=1e-2, rtol=1e-2), (q32, ref32)

    # --- bf16 streaming path: 2 pipelined grid steps (tile_b = 128, ragged tail) ---
    obs16, act16 = obs.astype(jnp.bfloat16), act.astype(jnp.bfloat16)
    q16 = jax.block_until_ready(mlp_q_function(obs16, act16, params, max_tile_b=128))
    # Reference on the same bf16-quantized inputs / layer-1 weights the kernel sees.
    (w1, b1), l2, l3 = params
    params_q = [(w1.astype(jnp.bfloat16).astype(jnp.float32), b1), l2, l3]
    ref16 = reference_q(obs16.astype(jnp.float32), act16.astype(jnp.float32), params_q)
    assert q16.shape == (batch,), q16.shape
    assert jnp.allclose(q16, ref16, atol=2e-2, rtol=2e-2), (q16, ref16)

    print("KERNEL_OK")
</pallas_src>

<mosaic_0001>
module attributes {stable_mosaic.version = 11 : i64} {
  func.func @qfunc_kernel(%arg0: i32, %arg1: memref<256x16xf32, #tpu.memory_space<vmem>>, %arg2: memref<256x8xf32, #tpu.memory_space<vmem>>, %arg3: memref<32x16xf32, #tpu.memory_space<vmem>>, %arg4: memref<32x8xf32, #tpu.memory_space<vmem>>, %arg5: memref<32x1xf32, #tpu.memory_space<vmem>>, %arg6: memref<32x32xf32, #tpu.memory_space<vmem>>, %arg7: memref<32x1xf32, #tpu.memory_space<vmem>>, %arg8: memref<1x32xf32, #tpu.memory_space<vmem>>, %arg9: memref<1x1xf32, #tpu.memory_space<smem>>, %arg10: memref<1x256xf32, #tpu.memory_space<vmem>>) attributes {dimension_semantics = [#tpu.dimension_semantics<parallel>], iteration_bounds = array<i64: 1>, scalar_prefetch = 0 : i64, scratch_operands = 0 : i64, tpu.core_type = #tpu.core_type<tc>, window_params = [{transform_indices = @transform_0, window_bounds = array<i64: 256, 16>}, {transform_indices = @transform_1, window_bounds = array<i64: 256, 8>}, {pipeline_mode = #tpu.pipeline_mode<synchronous>, transform_indices = @transform_2, window_bounds = array<i64: 32, 16>}, {pipeline_mode = #tpu.pipeline_mode<synchronous>, transform_indices = @transform_3, window_bounds = array<i64: 32, 8>}, {pipeline_mode = #tpu.pipeline_mode<synchronous>, transform_indices = @transform_4, window_bounds = array<i64: 32, 1>}, {pipeline_mode = #tpu.pipeline_mode<synchronous>, transform_indices = @transform_5, window_bounds = array<i64: 32, 32>}, {pipeline_mode = #tpu.pipeline_mode<synchronous>, transform_indices = @transform_6, window_bounds = array<i64: 32, 1>}, {pipeline_mode = #tpu.pipeline_mode<synchronous>, transform_indices = @transform_7, window_bounds = array<i64: 1, 32>}, {transform_indices = @transform_8, window_bounds = array<i64: 1, 1>}, {transform_indices = @transform_9, window_bounds = array<i64: 1, 256>}]} {
    %c0 = arith.constant 0 : index
    %c0_0 = arith.constant 0 : index
    %0 = vector.load %arg3[%c0, %c0_0] : memref<32x16xf32, #tpu.memory_space<vmem>>, vector<32x16xf32>
    %c0_1 = arith.constant 0 : index
    %c0_2 = arith.constant 0 : index
    %1 = vector.load %arg1[%c0_1, %c0_2] : memref<256x16xf32, #tpu.memory_space<vmem>>, vector<256x16xf32>
    %cst = arith.constant dense<0.000000e+00> : vector<32x256xf32>
    %2 = tpu.matmul %0, %1, %cst {dimension_numbers = #tpu.dot_dimension_numbers<[1], [1], [0], [0], [0, 0, 1, 0], [], []>} : vector<32x16xf32>, vector<256x16xf32>, vector<32x256xf32> -> vector<32x256xf32>
    %c0_3 = arith.constant 0 : index
    %c0_4 = arith.constant 0 : index
    %3 = vector.load %arg4[%c0_3, %c0_4] : memref<32x8xf32, #tpu.memory_space<vmem>>, vector<32x8xf32>
    %c0_5 = arith.constant 0 : index
    %c0_6 = arith.constant 0 : index
    %4 = vector.load %arg2[%c0_5, %c0_6] : memref<256x8xf32, #tpu.memory_space<vmem>>, vector<256x8xf32>
    %cst_7 = arith.constant dense<0.000000e+00> : vector<32x256xf32>
    %5 = tpu.matmul %3, %4, %cst_7 {dimension_numbers = #tpu.dot_dimension_numbers<[1], [1], [0], [0], [0, 0, 1, 0], [], []>} : vector<32x8xf32>, vector<256x8xf32>, vector<32x256xf32> -> vector<32x256xf32>
    %6 = arith.addf %2, %5 : vector<32x256xf32>
    %c0_8 = arith.constant 0 : index
    %c0_9 = arith.constant 0 : index
    %7 = vector.load %arg5[%c0_8, %c0_9] : memref<32x1xf32, #tpu.memory_space<vmem>>, vector<32x1xf32>
    %8 = vector.broadcast %7 : vector<32x1xf32> to vector<32x256xf32>
    %9 = arith.addf %6, %8 : vector<32x256xf32>
    %cst_10 = arith.constant 0.000000e+00 : f32
    %10 = vector.broadcast %cst_10 : f32 to vector<32x256xf32>
    %11 = arith.maximumf %9, %10 : vector<32x256xf32>
    %c0_11 = arith.constant 0 : index
    %c0_12 = arith.constant 0 : index
    %12 = vector.load %arg6[%c0_11, %c0_12] : memref<32x32xf32, #tpu.memory_space<vmem>>, vector<32x32xf32>
    %cst_13 = arith.constant dense<0.000000e+00> : vector<32x256xf32>
    %13 = tpu.matmul %12, %11, %cst_13 {dimension_numbers = #tpu.dot_dimension_numbers<[1], [0], [0], [1], [0, 0, 1, 1], [], []>} : vector<32x32xf32>, vector<32x256xf32>, vector<32x256xf32> -> vector<32x256xf32>
    %c0_14 = arith.constant 0 : index
    %c0_15 = arith.constant 0 : index
    %14 = vector.load %arg7[%c0_14, %c0_15] : memref<32x1xf32, #tpu.memory_space<vmem>>, vector<32x1xf32>
    %15 = vector.broadcast %14 : vector<32x1xf32> to vector<32x256xf32>
    %16 = arith.addf %13, %15 : vector<32x256xf32>
    %cst_16 = arith.constant 0.000000e+00 : f32
    %17 = vector.broadcast %cst_16 : f32 to vector<32x256xf32>
    %18 = arith.maximumf %16, %17 : vector<32x256xf32>
    %c0_17 = arith.constant 0 : index
    %c0_18 = arith.constant 0 : index
    %19 = vector.load %arg8[%c0_17, %c0_18] : memref<1x32xf32, #tpu.memory_space<vmem>>, vector<1x32xf32>
    %cst_19 = arith.constant dense<0.000000e+00> : vector<1x256xf32>
    %20 = tpu.matmul %19, %18, %cst_19 {dimension_numbers = #tpu.dot_dimension_numbers<[1], [0], [0], [1], [0, 0, 1, 1], [], []>} : vector<1x32xf32>, vector<32x256xf32>, vector<1x256xf32> -> vector<1x256xf32>
    %c0_20 = arith.constant 0 : index
    %c0_21 = arith.constant 0 : index
    %21 = memref.load %arg9[%c0_20, %c0_21] : memref<1x1xf32, #tpu.memory_space<smem>>
    %22 = vector.broadcast %21 : f32 to vector<1x256xf32>
    %23 = arith.addf %20, %22 : vector<1x256xf32>
    %c0_22 = arith.constant 0 : index
    %c0_23 = arith.constant 0 : index
    %24 = vector.load %arg10[%c0_22, %c0_23] : memref<1x256xf32, #tpu.memory_space<vmem>>, vector<1x256xf32>
    tpu.vector_store %arg10[%c0_22, %c0_23], %23 {strides = array<i32>} : memref<1x256xf32, #tpu.memory_space<vmem>>, vector<1x256xf32>,
    return
  }
  func.func @transform_0(%arg0: i32) -> (i32, i32) {
    %c0_i32 = arith.constant 0 : i32
    %c0_i32_0 = arith.constant 0 : i32
    return %arg0, %c0_i32 : i32, i32
  }
  func.func @transform_1(%arg0: i32) -> (i32, i32) {
    %c0_i32 = arith.constant 0 : i32
    %c0_i32_0 = arith.constant 0 : i32
    return %arg0, %c0_i32 : i32, i32
  }
  func.func @transform_2(%arg0: i32) -> (i32, i32) {
    %c0_i32 = arith.constant 0 : i32
    %c0_i32_0 = arith.constant 0 : i32
    %c0_i32_1 = arith.constant 0 : i32
    return %c0_i32, %c0_i32_0 : i32, i32
  }
  func.func @transform_3(%arg0: i32) -> (i32, i32) {
    %c0_i32 = arith.constant 0 : i32
    %c0_i32_0 = arith.constant 0 : i32
    %c0_i32_1 = arith.constant 0 : i32
    return %c0_i32, %c0_i32_0 : i32, i32
  }
  func.func @transform_4(%arg0: i32) -> (i32, i32) {
    %c0_i32 = arith.constant 0 : i32
    %c0_i32_0 = arith.constant 0 : i32
    %c0_i32_1 = arith.constant 0 : i32
    return %c0_i32, %c0_i32_0 : i32, i32
  }
  func.func @transform_5(%arg0: i32) -> (i32, i32) {
    %c0_i32 = arith.constant 0 : i32
    %c0_i32_0 = arith.constant 0 : i32
    %c0_i32_1 = arith.constant 0 : i32
    return %c0_i32, %c0_i32_0 : i32, i32
  }
  func.func @transform_6(%arg0: i32) -> (i32, i32) {
    %c0_i32 = arith.constant 0 : i32
    %c0_i32_0 = arith.constant 0 : i32
    %c0_i32_1 = arith.constant 0 : i32
    return %c0_i32, %c0_i32_0 : i32, i32
  }
  func.func @transform_7(%arg0: i32) -> (i32, i32) {
    %c0_i32 = arith.constant 0 : i32
    %c0_i32_0 = arith.constant 0 : i32
    %c0_i32_1 = arith.constant 0 : i32
    return %c0_i32, %c0_i32_0 : i32, i32
  }
  func.func @transform_8(%arg0: i32) -> (i32, i32) {
    %c0_i32 = arith.constant 0 : i32
    %c0_i32_0 = arith.constant 0 : i32
    %c0_i32_1 = arith.constant 0 : i32
    return %c0_i32, %c0_i32_0 : i32, i32
  }
  func.func @transform_9(%arg0: i32) -> (i32, i32) {
    %c0_i32 = arith.constant 0 : i32
    %c0_i32_0 = arith.constant 0 : i32
    return %c0_i32, %arg0 : i32, i32
  }
}

</mosaic_0001>

<bundles_post_ra>
// kernel: tpu_custom_call.1
= control target key start
LH: loop header
LB: loop body
LE: loop exit
PB: predicated region body
PF: predicated region fallthrough
CT: control target
= control target key end

     0   :  { %vm106_vm0 = vcmask 64512   ;;  %vm304_vm1 = vcmask 130048   ;;  %v1105_v7 = vmov 0   ;;  %s1539_s0 = inlined_call_operand.vmem [shape: f32[200,16], index: 0, kind: input, shape index: {}]   ;;  %s1540_s1 = inlined_call_operand.vmem [shape: f32[200,8], index: 1, kind: input, shape index: {}]   ;;  %s1541_s2 = inlined_call_operand.vmem [shape: f32[32,16], index: 2, kind: input, shape index: {}]   ;;  %s1542_s3 = inlined_call_operand.vmem [shape: f32[32,8], index: 3, kind: input, shape index: {}]   ;;  %s1543_s4 = inlined_call_operand.vmem [shape: f32[32,1], index: 4, kind: input, shape index: {}]   ;;  %s1544_s5 = inlined_call_operand.vmem [shape: f32[32,32], index: 5, kind: input, shape index: {}]   ;;  %s1545_s6 = inlined_call_operand.vmem [shape: f32[32,1], index: 6, kind: input, shape index: {}]   ;;  %s1546_s7 = inlined_call_operand.vmem [shape: f32[1,32], index: 7, kind: input, shape index: {}]   ;;  %s1547_s8 = inlined_call_operand.<no memory space> [shape: f32[1,1], index: 8, kind: input, shape index: {}]   ;;  %s1548_s9 = inlined_call_operand.hbm [shape: f32[1,200], index: 9, kind: output, shape index: {}]  }
   0x1   :  { %v90_v0 = vld [vmem:[%s1540_s1 + $0x80] sm:$0xff]  ;;  %v91_v1 = vld [vmem:[%s1540_s1 + $0x88] sm:$0xff]  ;;  %vm1170_vm2 = vmpackc.low %vm106_vm0, %vm106_vm0  ;;  %1079 = vset.pattern.permute.xlu0 %v1105_v7  ;;  %1080 = vset.pattern.permute.xlu1 %v1105_v7 }
   0x2   :  { %v54_v2 = vld [vmem:[%s1539_s0 + $0x80] sm:$0xff]  ;;  %v951_v3 = vpack.c.bf16 %v91_v1, %v90_v0  ;;  %v55_v5 = vld [vmem:[%s1539_s0 + $0x88] sm:$0xff]  ;;  %vm1182_vm3 = vmpackc.low %vm304_vm1, %vm304_vm1 }
   0x3   :  { %v74_v6 = vld [vmem:[%s1540_s1] sm:$0xff]  ;;  %v999_v8 = vpack.c.bf16 %v55_v5, %v54_v2  ;;  %v75_v10 = vld [vmem:[%s1540_s1 + $0x8] sm:$0xff]  ;;  %v92_v14 = vld [vmem:[%s1540_s1 + $0x90] sm:$0xff] }
   0x4   :  { %v38_v11 = vld [vmem:[%s1539_s0] sm:$0xff]  ;;  %953 = vmatprep.subr.msk.bf16.mxu1 %vm1170_vm2, %v951_v3  ;;  %v954_v12 = vpack.c.bf16 %v75_v10, %v74_v6  ;;  %v39_v13 = vld [vmem:[%s1539_s0 + $0x8] sm:$0xff]  ;;  %v93_v15 = vld [vmem:[%s1540_s1 + $0x98] sm:$0xff] }
   0x5   :  { %1001 = vmatprep.subr.msk.bf16.mxu0 %vm1182_vm3, %v999_v8  ;;  %v1002_v16 = vpack.c.bf16 %v39_v13, %v38_v11  ;;  %v957_v17 = vpack.c.bf16 %v93_v15, %v92_v14  ;;  %v56_v18 = vld [vmem:[%s1539_s0 + $0x90] sm:$0xff]  ;;  %v57_v19 = vld [vmem:[%s1539_s0 + $0x98] sm:$0xff]  ;;  %v94_v25 = vld [vmem:[%s1540_s1 + $0xa0] sm:$0xff] }
   0x6   :  { %956 = vmatpush3.bf16.xpose.msk.msra.mxu1 %vm1170_vm2, %v954_v12  ;;  %v1005_v20 = vpack.c.bf16 %v57_v19, %v56_v18  ;;  %v76_v21 = vld [vmem:[%s1540_s1 + $0x10] sm:$0xff]  ;;  %v77_v22 = vld [vmem:[%s1540_s1 + $0x18] sm:$0xff]  ;;  %v95_v26 = vld [vmem:[%s1540_s1 + $0xa8] sm:$0xff] }
   0x7   :  { %1004 = vmatpush3.bf16.xpose.msk.msra.mxu0 %vm1182_vm3, %v1002_v16  ;;  %959 = vmatprep.subr.msk.bf16.mxu1 %vm1170_vm2, %v957_v17  ;;  %v40_v23 = vld [vmem:[%s1539_s0 + $0x10] sm:$0xff]  ;;  %v41_v24 = vld [vmem:[%s1539_s0 + $0x18] sm:$0xff]  ;;  %v58_v27 = vld [vmem:[%s1539_s0 + $0xa0] sm:$0xff]  ;;  %v960_v29 = vpack.c.bf16 %v77_v22, %v76_v21  ;;  %v963_v31 = vpack.c.bf16 %v95_v26, %v94_v25 }
   0x8   :  { %1007 = vmatprep.subr.msk.bf16.mxu0 %vm1182_vm3, %v1005_v20  ;;  %v59_v28 = vld [vmem:[%s1539_s0 + $0xa8] sm:$0xff]  ;;  %v1008_v30 = vpack.c.bf16 %v41_v24, %v40_v23  ;;  %v78_v33 = vld [vmem:[%s1540_s1 + $0x20] sm:$0xff]  ;;  %v96_v37 = vld [vmem:[%s1540_s1 + $0xb0] sm:$0xff] }
   0x9   :  { %v1011_v32 = vpack.c.bf16 %v59_v28, %v58_v27  ;;  %v79_v34 = vld [vmem:[%s1540_s1 + $0x28] sm:$0xff]  ;;  %v42_v35 = vld [vmem:[%s1539_s0 + $0x20] sm:$0xff]  ;;  %v97_v38 = vld [vmem:[%s1540_s1 + $0xb8] sm:$0xff] }
   0xa   :  { %v43_v36 = vld [vmem:[%s1539_s0 + $0x28] sm:$0xff]  ;;  %v60_v39 = vld [vmem:[%s1539_s0 + $0xb0] sm:$0xff]  ;;  %v61_v40 = vld [vmem:[%s1539_s0 + $0xb8] sm:$0xff]  ;;  %v966_v41 = vpack.c.bf16 %v79_v34, %v78_v33  ;;  %v969_v43 = vpack.c.bf16 %v97_v38, %v96_v37 }
   0xb   :  { %v1014_v42 = vpack.c.bf16 %v43_v36, %v42_v35  ;;  %v1017_v44 = vpack.c.bf16 %v61_v40, %v60_v39  ;;  %v80_v45 = vld [vmem:[%s1540_s1 + $0x30] sm:$0xff]  ;;  %v81_v46 = vld [vmem:[%s1540_s1 + $0x38] sm:$0xff]  ;;  %v1293_v48 = vld [vmem:[%s1542_s3] sm:$0xff] }
   0xc   :  { %v44_v47 = vld [vmem:[%s1539_s0 + $0x30] sm:$0xff]  ;;  %v1298_v49 = vld [vmem:[%s1541_s2] sm:$0xff]  ;;  %v45_v50 = vld [vmem:[%s1539_s0 + $0x38] sm:$0xff]  ;;  %903 = vmatprep.mubr.msk.f32.mxu1 %vm106_vm0, %v1293_v48  ;;  %v972_v56 = vpack.c.bf16 %v81_v46, %v80_v45 }
   0xd   :  { %v98_v51 = vld [vmem:[%s1540_s1 + $0xc0] sm:$0xff]  ;;  %v99_v52 = vld [vmem:[%s1540_s1 + $0xc8] sm:$0xff]  ;;  %943 = vmatprep.mubr.msk.f32.mxu0 %vm304_vm1, %v1298_v49  ;;  %v504_v57 = vld [vmem:[%s1543_s4 + $0x10] sm:$0xff]  ;;  %v1020_v58 = vpack.c.bf16 %v45_v50, %v44_v47 }
   0xe   :  { %962 = vmatpush3.bf16.xpose.msk.msra.mxu1 %vm1170_vm2, %v960_v29  ;;  %v62_v53 = vld [vmem:[%s1539_s0 + $0xc0] sm:$0xff]  ;;  %v63_v54 = vld [vmem:[%s1539_s0 + $0xc8] sm:$0xff]  ;;  %v975_v59 = vpack.c.bf16 %v99_v52, %v98_v51  ;;  %518 = vperm.xlu1 %1080, %v504_v57  }
   0xf   :  { %1010 = vmatpush3.bf16.xpose.msk.msra.mxu0 %vm1182_vm3, %v1008_v30  ;;  %965 = vmatprep.subr.msk.bf16.mxu1 %vm1170_vm2, %v963_v31  ;;  %v502_v55 = vld [vmem:[%s1543_s4] sm:$0xff]  ;;  %v503_v60 = vld [vmem:[%s1543_s4 + $0x8] sm:$0xff]  ;;  %v1023_v61 = vpack.c.bf16 %v63_v54, %v62_v53 }
  0x10   :  { %1013 = vmatprep.subr.msk.bf16.mxu0 %vm1182_vm3, %v1011_v32  ;;  %508 = vperm.xlu0 %1079, %v502_v55  }
  0x16   :  { %968 = vmatpush3.bf16.xpose.msk.msra.mxu1 %vm1170_vm2, %v966_v41 }
  0x17   :  { %1016 = vmatpush3.bf16.xpose.msk.msra.mxu0 %vm1182_vm3, %v1014_v42  ;;  %971 = vmatprep.subr.msk.bf16.mxu1 %vm1170_vm2, %v969_v43 }
  0x18   :  { %1019 = vmatprep.subr.msk.bf16.mxu0 %vm1182_vm3, %v1017_v44 }
  0x19   :  { %15 = vsyncpa [#allocation4], 0  ;;  %v505_v62 = vld [vmem:[%s1543_s4 + $0x18] sm:$0xff]  ;;  %v82_v63 = vld [vmem:[%s1540_s1 + $0x40] sm:$0xff]  ;;  %513 = vperm.xlu0 %1079, %v503_v60   ;;  %v1106_v51 = vmov 0.0   ;;  %vm570_vm4 = vcmask 261120  }
  0x1a   :  { %v83_v0 = vld [vmem:[%s1540_s1 + $0x48] sm:$0xff]  ;;  %v46_v1 = vld [vmem:[%s1539_s0 + $0x40] sm:$0xff]  ;;  %v100_v5 = vld [vmem:[%s1540_s1 + $0xd0] sm:$0xff]  ;;  %523 = vperm.xlu1 %1080, %v505_v62   ;;  %s1108_s22 = smov [#allocation3]  }
  0x1b   :  { %v546_v2 = vld [vmem:[%s1545_s6] sm:$0xff]  ;;  %v47_v3 = vld [vmem:[%s1539_s0 + $0x48] sm:$0xff]  ;;  %v101_v6 = vld [vmem:[%s1540_s1 + $0xd8] sm:$0xff]  ;;  %v978_v11 = vpack.c.bf16 %v83_v0, %v82_v63  ;;  %s786_s23 = sshll.u32 %s1108_s22, 4  ;;  %s787_s23 = int_to_ptr.vmem [resolvable:$true] %s786_s23 }
  0x1c   :  { %v64_v7 = vld [vmem:[%s1539_s0 + $0xd0] sm:$0xff]  ;;  %v65_v8 = vld [vmem:[%s1539_s0 + $0xd8] sm:$0xff]  ;;  %v547_v10 = vld [vmem:[%s1545_s6 + $0x8] sm:$0xff]  ;;  %v1026_v12 = vpack.c.bf16 %v47_v3, %v46_v1  ;;  %v981_v13 = vpack.c.bf16 %v101_v6, %v100_v5  ;;  %p1086_p1 = scmp.lt.s32.totalorder %s787_s23, %s787_s23 }
  0x1d   :  { %552 = vperm.xlu0 %1079, %v546_v2   ;;  %v548_v14 = vld [vmem:[%s1545_s6 + $0x10] sm:$0xff]  ;;  %v1029_v15 = vpack.c.bf16 %v65_v8, %v64_v7  ;;  %v549_v16 = vld [vmem:[%s1545_s6 + $0x18] sm:$0xff]  ;;  %v102_v21 = vld [vmem:[%s1540_s1 + $0xe0] sm:$0xff] }
  0x1e   :  { %974 = vmatpush3.bf16.xpose.msk.msra.mxu1 %vm1170_vm2, %v972_v56  ;;  %557 = vperm.xlu1 %1080, %v547_v10   ;;  %v84_v17 = vld [vmem:[%s1540_s1 + $0x50] sm:$0xff]  ;;  %v85_v18 = vld [vmem:[%s1540_s1 + $0x58] sm:$0xff]  ;;  %v103_v22 = vld [vmem:[%s1540_s1 + $0xe8] sm:$0xff] }
  0x1f   :  { %1022 = vmatpush3.bf16.xpose.msk.msra.mxu0 %vm1182_vm3, %v1020_v58  ;;  %977 = vmatprep.subr.msk.bf16.mxu1 %vm1170_vm2, %v975_v59  ;;  %v48_v19 = vld [vmem:[%s1539_s0 + $0x50] sm:$0xff]  ;;  %v49_v20 = vld [vmem:[%s1539_s0 + $0x58] sm:$0xff]  ;;  %v66_v23 = vld [vmem:[%s1539_s0 + $0xe0] sm:$0xff]  ;;  %v984_v25 = vpack.c.bf16 %v85_v18, %v84_v17  ;;  %v987_v27 = vpack.c.bf16 %v103_v22, %v102_v21 }
  0x20   :  { %1025 = vmatprep.subr.msk.bf16.mxu0 %vm1182_vm3, %v1023_v61  ;;  %v67_v24 = vld [vmem:[%s1539_s0 + $0xe8] sm:$0xff]  ;;  %v1032_v26 = vpack.c.bf16 %v49_v20, %v48_v19  ;;  %v86_v29 = vld [vmem:[%s1540_s1 + $0x60] sm:$0xff]  ;;  %v104_v33 = vld [vmem:[%s1540_s1 + $0xf0] sm:$0xff] }
  0x21   :  { %562 = vperm.xlu0 %1079, %v548_v14   ;;  %v1035_v28 = vpack.c.bf16 %v67_v24, %v66_v23  ;;  %v87_v30 = vld [vmem:[%s1540_s1 + $0x68] sm:$0xff]  ;;  %v50_v31 = vld [vmem:[%s1539_s0 + $0x60] sm:$0xff]  ;;  %v105_v34 = vld [vmem:[%s1540_s1 + $0xf8] sm:$0xff] }
  0x22   :  { %567 = vperm.xlu1 %1080, %v549_v16   ;;  %v51_v32 = vld [vmem:[%s1539_s0 + $0x68] sm:$0xff]  ;;  %v68_v35 = vld [vmem:[%s1539_s0 + $0xf0] sm:$0xff]  ;;  %v69_v36 = vld [vmem:[%s1539_s0 + $0xf8] sm:$0xff]  ;;  %v990_v37 = vpack.c.bf16 %v87_v30, %v86_v29  ;;  %v993_v39 = vpack.c.bf16 %v105_v34, %v104_v33 }
  0x23   :  { %v1038_v38 = vpack.c.bf16 %v51_v32, %v50_v31  ;;  %v1041_v40 = vpack.c.bf16 %v69_v36, %v68_v35  ;;  %v88_v41 = vld [vmem:[%s1540_s1 + $0x70] sm:$0xff]  ;;  %v89_v42 = vld [vmem:[%s1540_s1 + $0x78] sm:$0xff]  ;;  %v71_v47 = vld [vmem:[%s1542_s3 + $0x8] sm:$0xff] }
  0x24   :  { %v52_v43 = vld [vmem:[%s1539_s0 + $0x70] sm:$0xff]  ;;  %v53_v44 = vld [vmem:[%s1539_s0 + $0x78] sm:$0xff]  ;;  %v996_v45 = vpack.c.bf16 %v89_v42, %v88_v41  ;;  %v35_v50 = vld [vmem:[%s1541_s2 + $0x8] sm:$0xff] }
  0x25   :  { %v1044_v46 = vpack.c.bf16 %v53_v44, %v52_v43  ;;  %v72_v4 = vld [vmem:[%s1542_s3 + $0x10] sm:$0xff]  ;;  %v545_v41 = vld [vmem:[%s1544_s5 + $0x18] sm:$0xff] }
  0x26   :  { %980 = vmatpush3.bf16.xpose.msk.msra.mxu1 %vm1170_vm2, %v978_v11  ;;  %v36_v9 = vld [vmem:[%s1541_s2 + $0x10] sm:$0xff] }
  0x27   :  { %1028 = vmatpush3.bf16.xpose.msk.msra.mxu0 %vm1182_vm3, %v1026_v12  ;;  %983 = vmatprep.subr.msk.bf16.mxu1 %vm1170_vm2, %v981_v13 }
  0x28   :  { %1031 = vmatprep.subr.msk.bf16.mxu0 %vm1182_vm3, %v1029_v15 }
  0x2e   :  { %986 = vmatpush3.bf16.xpose.msk.msra.mxu1 %vm1170_vm2, %v984_v25 }
  0x2f   :  { %1034 = vmatpush3.bf16.xpose.msk.msra.mxu0 %vm1182_vm3, %v1032_v26  ;;  %989 = vmatprep.subr.msk.bf16.mxu1 %vm1170_vm2, %v987_v27 }
  0x30   :  { %1037 = vmatprep.subr.msk.bf16.mxu0 %vm1182_vm3, %v1035_v28 }
  0x36   :  { %992 = vmatpush3.bf16.xpose.msk.msra.mxu1 %vm1170_vm2, %v990_v37 }
  0x37   :  { %1040 = vmatpush3.bf16.xpose.msk.msra.mxu0 %vm1182_vm3, %v1038_v38  ;;  %995 = vmatprep.subr.msk.bf16.mxu1 %vm1170_vm2, %v993_v39  ;;  %v542_v38 = vld [vmem:[%s1544_s5] sm:$0xff]  ;;  %v544_v39 = vld [vmem:[%s1544_s5 + $0x10] sm:$0xff] }
  0x38   :  { %1043 = vmatprep.subr.msk.bf16.mxu0 %vm1182_vm3, %v1041_v40  ;;  %v543_v40 = vld [vmem:[%s1544_s5 + $0x8] sm:$0xff] }
  0x3e   :  { %998 = vmatpush3.bf16.xpose.msk.msra.mxu1 %vm1170_vm2, %v996_v45 }
  0x3f   :  { %1046 = vmatpush3.bf16.xpose.msk.msra.mxu0 %vm1182_vm3, %v1044_v46 }
  0x45   :  { %904 = vmatmul.mubr.msk.f32.vlgmr.msra.gmra.mrb[0].mxu1 %vm106_vm0, %v1293_v48  ;;  %v73_v48 = vld [vmem:[%s1542_s3 + $0x18] sm:$0xff] }
  0x46   :  { %944 = vmatmul.mubr.msk.f32.vlgmr.msra.gmra.mrb[0].mxu0 %vm304_vm1, %v1298_v49  ;;  %905 = vmatprep.mubr.msk.f32.mxu1 %vm106_vm0, %v71_v47  ;;  %v37_v49 = vld [vmem:[%s1541_s2 + $0x18] sm:$0xff] }
  0x47   :  { %945 = vmatprep.mubr.msk.f32.mxu0 %vm304_vm1, %v35_v50 }
  0x49   :  { %906 = vmatmul.mubr.msk.f32.gmra.mrb[2].mxu1 %vm106_vm0, %v71_v47 }
  0x4a   :  { %946 = vmatmul.mubr.msk.f32.gmra.mrb[2].mxu0 %vm304_vm1, %v35_v50  ;;  %907 = vmatprep.mubr.msk.f32.mxu1 %vm106_vm0, %v72_v4 }
  0x4b   :  { %947 = vmatprep.mubr.msk.f32.mxu0 %vm304_vm1, %v36_v9 }
  0x4d   :  { %908 = vmatmul.mubr.msk.f32.gmra.mrb[4].mxu1 %vm106_vm0, %v72_v4 }
  0x4e   :  { %948 = vmatmul.mubr.msk.f32.gmra.mrb[4].mxu0 %vm304_vm1, %v36_v9  ;;  %909 = vmatprep.mubr.msk.f32.mxu1 %vm106_vm0, %v73_v48 }
  0x4f   :  { %949 = vmatprep.mubr.msk.f32.mxu0 %vm304_vm1, %v37_v49 }
  0x51   :  { %910 = vmatmul.mubr.msk.f32.gmra.mrb[6].mxu1 %vm106_vm0, %v73_v48 }
  0x52   :  { %950 = vmatmul.mubr.msk.f32.gmra.mrb[6].mxu0 %vm304_vm1, %v37_v49  ;;  %659 = vmatprep.mubr.f32.mxu1 %v1106_v51 }
  0x53   :  { %647 = vmatprep.mubr.f32.mxu0 %v1106_v51 }
  0x8d   :  { %v519_v5 = vpop.permute.xlu1 %518 }
  0x8f   :  { %v509_v52 = vpop.permute.xlu0 %508 }
  0x98   :  { %v514_v1 = vpop.permute.xlu0 %513 }
  0x99   :  { %v524_v27 = vpop.permute.xlu1 %523 }
  0x9c   :  { %v553_v42 = vpop.permute.xlu0 %552 }
  0x9d   :  { %v558_v43 = vpop.permute.xlu1 %557 }
  0xa0   :  { %v563_v50 = vpop.permute.xlu0 %562 }
  0xa1   :  { %v568_v4 = vpop.permute.xlu1 %567 }
 0x118   :  { %v281_v53 = vpop.f32.mrb[0].mxu1 }
 0x119   :  { %v479_v54 = vpop.f32.mrb[0].mxu0  ;;  %v283_v55 = vpop.f32.mrb[1].mxu1 }
 0x11a   :  { %v480_v56 = vadd.f32 %v479_v54, %v281_v53  ;;  %v481_v57 = vpop.f32.mrb[1].mxu0 }
 0x11b   :  { %v482_v58 = vadd.f32 %v481_v57, %v283_v55 }
 0x11c   :  { %v287_v59 = vpop.f32.mrb[2].mxu1  ;;  %v526_v62 = vadd.f32 %v509_v52, %v480_v56 }
 0x11d   :  { %v485_v60 = vpop.f32.mrb[2].mxu0  ;;  %v289_v61 = vpop.f32.mrb[3].mxu1  ;;  %v527_v2 = vadd.f32 %v509_v52, %v482_v58 }
 0x11e   :  { %v486_v63 = vadd.f32 %v485_v60, %v287_v59  ;;  %v487_v0 = vpop.f32.mrb[3].mxu0  ;;  %v534_v12 = vmax.f32 %v526_v62, 0.0 }
 0x11f   :  { %v488_v3 = vadd.f32 %v487_v0, %v289_v61  ;;  %v535_v16 = vmax.f32 %v527_v2, 0.0 }
 0x120   :  { %v528_v6 = vadd.f32 %v514_v1, %v486_v63  ;;  %v293_v7 = vpop.f32.mrb[4].mxu1 }
 0x121   :  { %v529_v8 = vadd.f32 %v514_v1, %v488_v3  ;;  %v491_v10 = vpop.f32.mrb[4].mxu0  ;;  %v295_v11 = vpop.f32.mrb[5].mxu1 }
 0x122   :  { %v536_v13 = vmax.f32 %v528_v6, 0.0  ;;  %v492_v14 = vadd.f32 %v491_v10, %v293_v7  ;;  %v493_v15 = vpop.f32.mrb[5].mxu0  ;;  %v680_v10 = vld [vmem:[%s1546_s7] sm:$0x1]  ;;  %s1081_s7 = scalar_lea.vmem %s787_s23, 32 }
 0x123   :  { %v537_v17 = vmax.f32 %v529_v8, 0.0  ;;  %v494_v18 = vadd.f32 %v493_v15, %v295_v11  ;;  %v1107_v11 = vmov 1966171168   ;;  %p1082_p0 = scmp.ne.s32.totalorder %s787_s23, %s1081_s7  ;;  %p1087_p2 = scmp.lt.s32.totalorder %s1081_s7, %s1081_s7 }
 0x124   :  { %v1049_v19 = vpack.c.bf16 %v536_v13, %v534_v12  ;;  %v299_v20 = vpop.f32.mrb[6].mxu1  ;;  %v530_v24 = vadd.f32 %v519_v5, %v492_v14  ;;  %v761_v12 = vunpack.c.l.s4 %v1107_v11  ;;  %v763_v13 = vlaneseq }
 0x125   :  { %v497_v21 = vpop.f32.mrb[6].mxu0  ;;  %v301_v22 = vpop.f32.mrb[7].mxu1  ;;  %v1047_v23 = vpack.c.bf16 %v537_v17, %v535_v16  ;;  %v531_v28 = vadd.f32 %v519_v5, %v494_v18  ;;  %v682_v14 = vstv %s1547_s8  ;;  %p1088_p3 = por %p1087_p2, %p1086_p1 }
 0x126   :  { %v498_v25 = vadd.f32 %v497_v21, %v299_v20  ;;  %v499_v26 = vpop.f32.mrb[7].mxu0  ;;  %v538_v32 = vmax.f32 %v530_v24, 0.0  ;;  %v762_v15 = vunpack.c.0.s8 %v761_v12  ;;  %v764_v16 = vshrl.u32 %v763_v13, 7 }
 0x127   :  { %v500_v29 = vadd.f32 %v499_v26, %v301_v22  ;;  %1048 = vmatprep.subr.bf16.mxu0 %v1047_v23  ;;  %1063 = vmatprep.subr.bf16.mxu1 %v1047_v23  ;;  %v539_v34 = vmax.f32 %v531_v28, 0.0  ;;  %vm777_vm5 = vcmp.lt.s32.totalorder %v763_v13, 256  ;;  %p1089_p4 = pnand %p1088_p3, %p1082_p0 }
 0x128   :  { %v532_v30 = vadd.f32 %v524_v27, %v498_v25  ;;  %1050 = vmatpush1.bf16.msra.mxu0 %v1049_v19  ;;  %1065 = vmatpush1.bf16.msra.mxu1 %v1049_v19  ;;  %v765_v21 = vsub.s32 %v762_v15, %v764_v16 }
 0x129   :  { %v533_v31 = vadd.f32 %v524_v27, %v500_v29 }
 0x12a   :  { %v540_v33 = vmax.f32 %v532_v30, 0.0 }
 0x12b   :  { %v541_v35 = vmax.f32 %v533_v31, 0.0 }
 0x12c   :  { %v1053_v36 = vpack.c.bf16 %v540_v33, %v538_v32 }
 0x12d   :  { %v1051_v37 = vpack.c.bf16 %v541_v35, %v539_v34 }
 0x12f   :  { %1052 = vmatprep.subr.bf16.mxu0 %v1051_v37  ;;  %1064 = vmatprep.subr.bf16.mxu1 %v1051_v37 }
 0x130   :  { %1054 = vmatpush1.bf16.msra.mxu0 %v1053_v36  ;;  %1066 = vmatpush1.bf16.msra.mxu1 %v1053_v36 }
 0x133   :  { %866 = vmatmul.mubr.msk.f32.vlgmr.msra.gmra.mrb[8].mxu0 %vm570_vm4, %v542_v38  ;;  %868 = vmatmul.mubr.msk.f32.vlgmr.msra.gmra.mrb[8].mxu1 %vm570_vm4, %v544_v39 }
 0x134   :  { %653 = vmatprep.mubr.f32.mxu0 %v1106_v51  ;;  %665 = vmatprep.mubr.f32.mxu1 %v1106_v51 }
 0x137   :  { %867 = vmatmul.mubr.msk.f32.gmra.mrb[10].mxu0 %vm570_vm4, %v543_v40  ;;  %869 = vmatmul.mubr.msk.f32.gmra.mrb[10].mxu1 %vm570_vm4, %v545_v41 }
 0x138   :  { %750 = vmatprep.mubr.f32.mxu1 %v1106_v51 }
 0x206   :  { %v649_v44 = vpop.f32.mrb[8].mxu0  ;;  %v661_v45 = vpop.f32.mrb[8].mxu1 }
 0x207   :  { %v651_v46 = vpop.f32.mrb[9].mxu0  ;;  %v663_v47 = vpop.f32.mrb[9].mxu1  ;;  %v650_v9 = vadd.f32 %v649_v44, %v553_v42  ;;  %v662_v48 = vadd.f32 %v661_v45, %v563_v50 }
 0x208   :  { %v652_v49 = vadd.f32 %v651_v46, %v553_v42  ;;  %v664_v52 = vadd.f32 %v663_v47, %v563_v50 }
 0x209   :  { %v672_v60 = vmax.f32 %v650_v9, 0.0  ;;  %v676_v61 = vmax.f32 %v662_v48, 0.0 }
 0x20a   :  { %v655_v53 = vpop.f32.mrb[10].mxu0  ;;  %v667_v54 = vpop.f32.mrb[10].mxu1  ;;  %v673_v0 = vmax.f32 %v652_v49, 0.0  ;;  %v677_v1 = vmax.f32 %v664_v52, 0.0 }
 0x20b   :  { %v656_v55 = vadd.f32 %v655_v53, %v558_v43  ;;  %v668_v56 = vadd.f32 %v667_v54, %v568_v4  ;;  %v657_v57 = vpop.f32.mrb[11].mxu0  ;;  %v669_v58 = vpop.f32.mrb[11].mxu1 }
 0x20c   :  { %v658_v59 = vadd.f32 %v657_v57, %v558_v43  ;;  %v670_v51 = vadd.f32 %v669_v58, %v568_v4 }
 0x20d   :  { %v674_v62 = vmax.f32 %v656_v55, 0.0  ;;  %v678_v63 = vmax.f32 %v668_v56, 0.0 }
 0x20e   :  { %v675_v2 = vmax.f32 %v658_v59, 0.0  ;;  %v679_v3 = vmax.f32 %v670_v51, 0.0 }
 0x20f   :  { %v1057_v5 = vpack.c.bf16 %v674_v62, %v672_v60  ;;  %v1061_v6 = vpack.c.bf16 %v678_v63, %v676_v61 }
 0x210   :  { %v1055_v7 = vpack.c.bf16 %v675_v2, %v673_v0  ;;  %v1059_v8 = vpack.c.bf16 %v679_v3, %v677_v1 }
 0x212   :  { %1056 = vmatprep.subr.bf16.mxu1 %v1055_v7 }
 0x213   :  { %1058 = vmatpush1.bf16.msra.mxu1 %v1057_v5 }
 0x214   :  { %1060 = vmatprep.subr.bf16.mxu1 %v1059_v8 }
 0x217   :  { %1062 = vmatpush1.bf16.msra.mxu1 %v1061_v6 }
 0x21a   :  { %870 = vmatmul.mubr.msk.f32.vlgmr.msra.gmra.mrb[12].mxu1 %vm570_vm4, %v680_v10 }
 0x2ed   :  { %v752_v17 = vpop.f32.mrb[12].mxu1 }
 0x2ee   :  { %v753_v18 = vadd.f32 %v752_v17, %v682_v14  ;;  %v754_v19 = vpop.f32.mrb[13].mxu1 }
 0x2ef   :  { %v755_v20 = vadd.f32 %v754_v19, %v682_v14 }
 0x2f1   :  { %v759_v22 = vcombine.low %v753_v18, %v755_v20 }
 0x2f3   :  { %v766_v23 = vrot.slane %v759_v22, %v765_v21 }
 0x2f5   :  { %v773_v24 = vrot.slane %v766_v23, %v765_v21 }
 0x2f7   :  { %779 = vst.msk [vmem:[#allocation3] sm:$0x3] %vm777_vm5, %v773_v24 }
 0x2f8   :  { %1092 = shalt.err (!%p1089_p4)
}
 0x2f9   :  { %s1093_s25 = scalar_lea.hbm %s1548_s9, 32 }
 0x2fa   :  { %p1094_p5 = scmp.ne.s32.totalorder %s1548_s9, %s1093_s25  ;;  %p1097_p6 = scmp.lt.u32.totalorder %s1093_s25, %s1548_s9 }
 0x2fc   :  { %p1099_p7 = pnand %p1097_p6, %p1094_p5 }
 0x2fe   :  { %1102 = shalt.err (!%p1099_p7)
}
 0x2ff   :  { %789 = dma.vmem_to_hbm [thread:$0]  %s787_s23, 32, %s1548_s9, [#allocation4]  }
 0x300   :  { %1103 = dma.done.wait [#allocation4], 32  }
 0x301   :  { %1104 = vsyncadd [#allocation4], 4294967264 }
 0x302   :  { %793 = vsyncpa [#allocation4], 1 }

</bundles_post_ra>
